<compile_context>
chip_gen: v6e
topology: v6e:2x2x1
jax: 0.10.0
libtpu: 0.0.40
codegen_flags: <defaults>
</compile_context>

<pallas_src>
import functools
import math

import jax
import jax.numpy as jnp
from jax import lax
from jax.experimental import pallas as pl
from jax.experimental.pallas import tpu as pltpu


_MAX_BLOCK_BYTES = 4 * 1024 * 1024  # per output block; 2x (double-buffered) is safe on all chips


def _affine_grid_kernel(theta_ref, o_ref, *, Bb, G, TR, LANES, W,
                        sx, ox, sy, oy):
    """Writes one (Bb, TR, LANES) tile of the grouped-interleaved affine grid.

    Per-batch layout is (H/G, G*2W).  Within an output row, lane k holds
      rr = k // (2W)   (image row within the group of G rows)
      j  = (k % (2W)) >> 1
      c  = k & 1       (0 -> x channel, 1 -> y channel)
    so the image row is  i = (tile_row_offset + row) * G + rr  and a plain
    contiguous reshape yields PyTorch's (B, H, W, 2) layout.
    """
    bi = pl.program_id(0)
    r0 = pl.program_id(1) * TR
    two_w = 2 * W

    # Per-lane index decomposition -- computed once per grid step (hoisted).
    lane = lax.broadcasted_iota(jnp.int32, (1, LANES), 1)
    rr = jnp.zeros((1, LANES), jnp.int32)          # rr = lane // (2W), built
    for gi in range(1, G):                         # without vector int division.
        rr = rr + jnp.where(lane >= gi * two_w, 1, 0)
    j = (lane - rr * two_w) >> 1
    even = (lane & 1) == 0                         # even lane -> x channel

    x = j.astype(jnp.float32) * sx + ox            # (1, LANES) normalized x_j
    y0 = rr.astype(jnp.float32) * sy + oy          # (1, LANES) y at group base row
    dy = jnp.float32(sy * G)                       # y increment per output row

    row = (lax.broadcasted_iota(jnp.int32, (TR, 1), 0) + r0).astype(jnp.float32)

    for bb in range(Bb):                           # static unroll over fused batches
        base = (bi * Bb + bb) * 6
        t00 = theta_ref[base + 0]
        t01 = theta_ref[base + 1]
        t02 = theta_ref[base + 2]
        t10 = theta_ref[base + 3]
        t11 = theta_ref[base + 4]
        t12 = theta_ref[base + 5]
        cx = jnp.where(even, t00, t10)
        cy = jnp.where(even, t01, t11)
        cb = jnp.where(even, t02, t12)
        l1 = cx * x + cy * y0 + cb                 # (1, LANES)
        l2 = cy * dy                               # (1, LANES)
        # One broadcast multiply + one add per output vreg.
        o_ref[bb] = (l1 + l2 * row).astype(o_ref.dtype)


def _largest_divisor_le(n, cap):
    cap = max(1, min(n, cap))
    for d in range(cap, 0, -1):
        if n % d == 0:
            return d
    return 1


def affine_grid_gen(theta, out_h=240, out_w=240, out_ch=3,
                    align_corners=False, dtype=jnp.float32):
    """JAX/Pallas equivalent of AffineGridGen(out_h, out_w, out_ch)(theta).

    theta: (B, 2, 3) float32.  Returns (B, out_h, out_w, 2) in `dtype`.
    out_ch only sets the (unused) channel count of the size passed to
    F.affine_grid, so it does not influence the grid values.
    """
    theta = jnp.asarray(theta, jnp.float32)
    if theta.ndim != 3 or theta.shape[1:] != (2, 3):
        raise ValueError(f"theta must have shape (B, 2, 3), got {theta.shape}")
    B = int(theta.shape[0])
    H, W = int(out_h), int(out_w)
    two_w = 2 * W
    itemsize = jnp.dtype(dtype).itemsize

    # Normalized-coordinate maps: x = sx*j + ox, y = sy*i + oy.
    if align_corners:   # legacy (pre-1.3) AffineGridGen semantics
        sx, ox = 2.0 / max(W - 1, 1), -1.0
        sy, oy = 2.0 / max(H - 1, 1), -1.0
    else:               # modern F.affine_grid default
        sx, ox = 2.0 / W, 1.0 / W - 1.0
        sy, oy = 2.0 / H, 1.0 / H - 1.0

    # Layout: grouped-interleaved (B, H/G, G*2W) so the lane dim is a multiple
    # of 128.  Fallback G=1 -> (B, H, 2W) (masked stores) only when H % G != 0.
    g = 128 // math.gcd(two_w, 128)
    G = g if (H % g == 0) else 1
    lanes = G * two_w
    n_rows = H // G

    # Row tile: the biggest multiple-of-8 tile under the block-byte cap.
    row_bytes = lanes * itemsize
    max_rows = max(1, _MAX_BLOCK_BYTES // row_bytes)
    tr = n_rows if n_rows <= max_rows else max(8, (max_rows // 8) * 8)

    # Batch fusion: pack Bb whole batch elements per block (amortizes the
    # ~0.35us fixed per-step overhead) when a block already spans full rows.
    Bb = 1
    if tr == n_rows:
        per_batch = n_rows * row_bytes
        Bb = _largest_divisor_le(B, min(16, max(1, _MAX_BLOCK_BYTES // per_batch)))

    # v7x: guarantee >= 2 parallel grid steps so both TensorCores get work.
    if (B // Bb) * pl.cdiv(n_rows, tr) < 2:
        if B > 1:
            Bb = _largest_divisor_le(B, B // 2)          # >= 2 batch groups
        elif n_rows > 8:
            tr = ((n_rows + 1) // 2 + 7) // 8 * 8        # >= 2 row tiles

    grid = (B // Bb, pl.cdiv(n_rows, tr))

    kernel = functools.partial(
        _affine_grid_kernel, Bb=Bb, G=G, TR=tr, LANES=lanes, W=W,
        sx=sx, ox=ox, sy=sy, oy=oy)

    out = pl.pallas_call(
        kernel,
        out_shape=jax.ShapeDtypeStruct((B, n_rows, lanes), dtype),
        grid=grid,
        in_specs=[
            # Whole flattened theta resides in SMEM; constant index_map means
            # it is copied in once (not once per step) and read with dynamic
            # scalar indices inside the kernel.
            pl.BlockSpec((B * 6,), lambda bi, ri: (0,),
                         memory_space=pltpu.SMEM),
        ],
        out_specs=pl.BlockSpec((Bb, tr, lanes), lambda bi, ri: (bi, ri, 0)),
        compiler_params=pltpu.CompilerParams(
            dimension_semantics=("parallel", "parallel")),
        cost_estimate=pl.CostEstimate(
            flops=4 * B * H * W,
            transcendentals=0,
            bytes_accessed=B * (2 * H * W * itemsize + 24)),
    )(theta.reshape(B * 6))

    # Free, contiguous reshape into PyTorch's (B, H, W, 2) layout (no transpose).
    return out.reshape(B, H, W, 2)


def _reference(theta, out_h, out_w):
    # Pure-JAX reference of F.affine_grid (align_corners=False).
    xs = (2.0 * jnp.arange(out_w, dtype=jnp.float32) + 1.0) / out_w - 1.0
    ys = (2.0 * jnp.arange(out_h, dtype=jnp.float32) + 1.0) / out_h - 1.0
    xg, yg = jnp.meshgrid(xs, ys, indexing="xy")              # (H, W)
    base = jnp.stack([xg, yg, jnp.ones_like(xg)], axis=-1)    # (H, W, 3)
    return jnp.einsum("hwk,bck->bhwc", base, theta)           # (B, H, W, 2)


if __name__ == "__main__":
    key = jax.random.PRNGKey(0)
    theta2 = jax.random.normal(key, (2, 2, 3), dtype=jnp.float32)
    theta1 = theta2[:1]

    cases = [
        (theta2, 16, 16),    # grouped: G=4, lanes=128
        (theta2, 8, 24),     # grouped: G=8, lanes=384 (single grouped row)
        (theta2, 240, 240),  # module default: grouped (B, 60, 1920) layout
        (theta1, 240, 240),  # B=1: rows split so v7x gets 2 parallel steps
        (theta2, 12, 10),    # fallback plain-interleaved path (H % G != 0)
    ]
    for th, H, W in cases:
        out = jax.block_until_ready(affine_grid_gen(th, out_h=H, out_w=W, out_ch=3))
        ref = _reference(th, H, W)
        assert out.shape == (th.shape[0], H, W, 2), (H, W, out.shape)
        assert bool(jnp.allclose(out, ref, atol=1e-5, rtol=1e-5)), (H, W)

    print("KERNEL_OK")
</pallas_src>

<mosaic_0001>
module attributes {stable_mosaic.version = 11 : i64} {
  func.func @_affine_grid_kernel(%arg0: i32, %arg1: i32, %arg2: memref<12xf32, #tpu.memory_space<smem>>, %arg3: memref<1x4x128xf32, #tpu.memory_space<vmem>>) attributes {dimension_semantics = [#tpu.dimension_semantics<parallel>, #tpu.dimension_semantics<parallel>], iteration_bounds = array<i64: 2, 1>, scalar_prefetch = 0 : i64, scratch_operands = 0 : i64, tpu.core_type = #tpu.core_type<tc>, window_params = [{transform_indices = @transform_0, window_bounds = array<i64: 12>}, {transform_indices = @transform_1, window_bounds = array<i64: 1, 4, 128>}]} {
    %c4_i32 = arith.constant 4 : i32
    %0 = arith.muli %arg1, %c4_i32 : i32
    %1 = tpu.iota {dimensions = array<i32: 1>} : vector<1x128xi32>
    %c0_i32 = arith.constant 0 : i32
    %2 = vector.broadcast %c0_i32 : i32 to vector<1x128xi32>
    %c32_i32 = arith.constant 32 : i32
    %3 = vector.broadcast %c32_i32 : i32 to vector<1x128xi32>
    %4 = arith.cmpi sge, %1, %3 : vector<1x128xi32>
    %c1_i32 = arith.constant 1 : i32
    %c0_i32_0 = arith.constant 0 : i32
    %5 = vector.broadcast %c1_i32 : i32 to vector<1x128xi32>
    %6 = vector.broadcast %c0_i32_0 : i32 to vector<1x128xi32>
    %7 = arith.select %4, %5, %6 : vector<1x128xi1>, vector<1x128xi32>
    %8 = arith.addi %2, %7 : vector<1x128xi32>
    %c64_i32 = arith.constant 64 : i32
    %9 = vector.broadcast %c64_i32 : i32 to vector<1x128xi32>
    %10 = arith.cmpi sge, %1, %9 : vector<1x128xi32>
    %c1_i32_1 = arith.constant 1 : i32
    %c0_i32_2 = arith.constant 0 : i32
    %11 = vector.broadcast %c1_i32_1 : i32 to vector<1x128xi32>
    %12 = vector.broadcast %c0_i32_2 : i32 to vector<1x128xi32>
    %13 = arith.select %10, %11, %12 : vector<1x128xi1>, vector<1x128xi32>
    %14 = arith.addi %8, %13 : vector<1x128xi32>
    %c96_i32 = arith.constant 96 : i32
    %15 = vector.broadcast %c96_i32 : i32 to vector<1x128xi32>
    %16 = arith.cmpi sge, %1, %15 : vector<1x128xi32>
    %c1_i32_3 = arith.constant 1 : i32
    %c0_i32_4 = arith.constant 0 : i32
    %17 = vector.broadcast %c1_i32_3 : i32 to vector<1x128xi32>
    %18 = vector.broadcast %c0_i32_4 : i32 to vector<1x128xi32>
    %19 = arith.select %16, %17, %18 : vector<1x128xi1>, vector<1x128xi32>
    %20 = arith.addi %14, %19 : vector<1x128xi32>
    %c32_i32_5 = arith.constant 32 : i32
    %21 = vector.broadcast %c32_i32_5 : i32 to vector<1x128xi32>
    %22 = arith.muli %20, %21 : vector<1x128xi32>
    %23 = arith.subi %1, %22 : vector<1x128xi32>
    %c1_i32_6 = arith.constant 1 : i32
    %24 = vector.broadcast %c1_i32_6 : i32 to vector<1x128xi32>
    %25 = arith.shrsi %23, %24 : vector<1x128xi32>
    %c1_i32_7 = arith.constant 1 : i32
    %26 = vector.broadcast %c1_i32_7 : i32 to vector<1x128xi32>
    %27 = arith.andi %1, %26 : vector<1x128xi32>
    %c0_i32_8 = arith.constant 0 : i32
    %28 = vector.broadcast %c0_i32_8 : i32 to vector<1x128xi32>
    %29 = arith.cmpi eq, %27, %28 : vector<1x128xi32>
    %30 = arith.sitofp %25 : vector<1x128xi32> to vector<1x128xf32>
    %cst = arith.constant 1.250000e-01 : f32
    %31 = vector.broadcast %cst : f32 to vector<1x128xf32>
    %32 = arith.mulf %30, %31 : vector<1x128xf32>
    %cst_9 = arith.constant -9.375000e-01 : f32
    %33 = vector.broadcast %cst_9 : f32 to vector<1x128xf32>
    %34 = arith.addf %32, %33 : vector<1x128xf32>
    %35 = arith.sitofp %20 : vector<1x128xi32> to vector<1x128xf32>
    %cst_10 = arith.constant 1.250000e-01 : f32
    %36 = vector.broadcast %cst_10 : f32 to vector<1x128xf32>
    %37 = arith.mulf %35, %36 : vector<1x128xf32>
    %cst_11 = arith.constant -9.375000e-01 : f32
    %38 = vector.broadcast %cst_11 : f32 to vector<1x128xf32>
    %39 = arith.addf %37, %38 : vector<1x128xf32>
    %40 = tpu.iota {dimensions = array<i32: 0>} : vector<4x1xi32>
    %41 = vector.broadcast %0 : i32 to vector<4x1xi32>
    %42 = arith.addi %40, %41 : vector<4x1xi32>
    %43 = arith.sitofp %42 : vector<4x1xi32> to vector<4x1xf32>
    %c1_i32_12 = arith.constant 1 : i32
    %44 = arith.muli %arg0, %c1_i32_12 : i32
    %c0_i32_13 = arith.constant 0 : i32
    %45 = arith.addi %44, %c0_i32_13 : i32
    %c6_i32 = arith.constant 6 : i32
    %46 = arith.muli %45, %c6_i32 : i32
    %c0_i32_14 = arith.constant 0 : i32
    %47 = arith.addi %46, %c0_i32_14 : i32
    %48 = arith.index_cast %47 : i32 to index
    %49 = memref.load %arg2[%48] : memref<12xf32, #tpu.memory_space<smem>>
    %c1_i32_15 = arith.constant 1 : i32
    %50 = arith.addi %46, %c1_i32_15 : i32
    %51 = arith.index_cast %50 : i32 to index
    %52 = memref.load %arg2[%51] : memref<12xf32, #tpu.memory_space<smem>>
    %c2_i32 = arith.constant 2 : i32
    %53 = arith.addi %46, %c2_i32 : i32
    %54 = arith.index_cast %53 : i32 to index
    %55 = memref.load %arg2[%54] : memref<12xf32, #tpu.memory_space<smem>>
    %c3_i32 = arith.constant 3 : i32
    %56 = arith.addi %46, %c3_i32 : i32
    %57 = arith.index_cast %56 : i32 to index
    %58 = memref.load %arg2[%57] : memref<12xf32, #tpu.memory_space<smem>>
    %c4_i32_16 = arith.constant 4 : i32
    %59 = arith.addi %46, %c4_i32_16 : i32
    %60 = arith.index_cast %59 : i32 to index
    %61 = memref.load %arg2[%60] : memref<12xf32, #tpu.memory_space<smem>>
    %c5_i32 = arith.constant 5 : i32
    %62 = arith.addi %46, %c5_i32 : i32
    %63 = arith.index_cast %62 : i32 to index
    %64 = memref.load %arg2[%63] : memref<12xf32, #tpu.memory_space<smem>>
    %65 = vector.broadcast %49 : f32 to vector<1x128xf32>
    %66 = vector.broadcast %58 : f32 to vector<1x128xf32>
    %67 = arith.select %29, %65, %66 : vector<1x128xi1>, vector<1x128xf32>
    %68 = vector.broadcast %52 : f32 to vector<1x128xf32>
    %69 = vector.broadcast %61 : f32 to vector<1x128xf32>
    %70 = arith.select %29, %68, %69 : vector<1x128xi1>, vector<1x128xf32>
    %71 = vector.broadcast %55 : f32 to vector<1x128xf32>
    %72 = vector.broadcast %64 : f32 to vector<1x128xf32>
    %73 = arith.select %29, %71, %72 : vector<1x128xi1>, vector<1x128xf32>
    %74 = arith.mulf %67, %34 : vector<1x128xf32>
    %75 = arith.mulf %70, %39 : vector<1x128xf32>
    %76 = arith.addf %74, %75 : vector<1x128xf32>
    %77 = arith.addf %76, %73 : vector<1x128xf32>
    %cst_17 = arith.constant 5.000000e-01 : f32
    %78 = vector.broadcast %cst_17 : f32 to vector<1x128xf32>
    %79 = arith.mulf %70, %78 : vector<1x128xf32>
    %80 = vector.broadcast %79 : vector<1x128xf32> to vector<4x128xf32>
    %81 = vector.broadcast %43 : vector<4x1xf32> to vector<4x128xf32>
    %82 = arith.mulf %80, %81 : vector<4x128xf32>
    %83 = vector.broadcast %77 : vector<1x128xf32> to vector<4x128xf32>
    %84 = arith.addf %83, %82 : vector<4x128xf32>
    %c0 = arith.constant 0 : index
    %c0_18 = arith.constant 0 : index
    %c0_19 = arith.constant 0 : index
    %85 = vector.load %arg3[%c0, %c0_18, %c0_19] : memref<1x4x128xf32, #tpu.memory_space<vmem>>, vector<1x4x128xf32>
    %86 = vector.shape_cast %85 : vector<1x4x128xf32> to vector<4x128xf32>
    %87 = vector.shape_cast %84 : vector<4x128xf32> to vector<1x4x128xf32>
    tpu.vector_store %arg3[%c0, %c0_18, %c0_19], %87 {strides = array<i32>} : memref<1x4x128xf32, #tpu.memory_space<vmem>>, vector<1x4x128xf32>,
    return
  }
  func.func @transform_0(%arg0: i32, %arg1: i32) -> i32 {
    %c0_i32 = arith.constant 0 : i32
    %c0_i32_0 = arith.constant 0 : i32
    return %c0_i32 : i32
  }
  func.func @transform_1(%arg0: i32, %arg1: i32) -> (i32, i32, i32) {
    %c0_i32 = arith.constant 0 : i32
    %c0_i32_0 = arith.constant 0 : i32
    return %arg0, %arg1, %c0_i32 : i32, i32, i32
  }
}

</mosaic_0001>

<bundles_post_ra>
// kernel: tpu_custom_call.1
= control target key start
LH: loop header
LB: loop body
LE: loop exit
PB: predicated region body
PF: predicated region fallthrough
CT: control target
= control target key end

     0   :  { %6 = vsyncpa [#allocation4], 0  ;;  %s555_s0 = inlined_call_operand.hbm [shape: f32[12], index: 0, kind: input, shape index: {}]   ;;  %s556_s1 = inlined_call_operand.hbm [shape: f32[2,4,128], index: 1, kind: output, shape index: {}]  }
   0x1   :  { %7 = vsyncpa [#allocation3], 0 }
   0x2   :  { %9 = vsyncpa [#allocation3 + $0x1], 0  ;;  %s444_s6 = smov 0   ;;  %s446_s7 = smov 0  }
   0x3   :  { %s448_s8 = smov 0   ;;  %s450_s9 = smov 0  }
   0x4   :  { %s452_s10 = smov 0   ;;  %s454_s11 = smov 0  }
   0x5 LB: > { %s260_s12 = sadd.s32 4294967295, %s429_s11   ;;  %s261_s13 = sadd.s32 4294967294, %s429_s11   ;;  %s429_s11 = sphi %s454_s11, %s15_s11   ;;  %s425_s10 = sphi %s452_s10, %s565_s10   ;;  %s421_s9 = sphi %s450_s9, %s564_s9   ;;  %s417_s8 = sphi %s448_s8, %s563_s8   ;;  %s413_s7 = sphi %s446_s7, %s562_s7   ;;  %s409_s6 = sphi %s444_s6, %s561_s6  }
   0x6   : > { %s27_s14 = sadd.s32 1, %s425_s10  ;;  %s57_s15 = sadd.s32 1, %s417_s8 }
   0x7   : > { %p29_p0 = scmp.ge.s32.totalorder %s27_s14, 2  ;;  %p67_p1 = scmp.ne.s32.totalorder %s417_s8, %s413_s7 }
   0x8   : > { %p68_p2 = scmp.eq.s32.totalorder %s260_s12, 1  ;;  %p73_p3 = scmp.ne.s32.totalorder %s413_s7, %s409_s6 }
   0x9   : > { %s567_s14 = smov (%p29_p0, %s27_s14), 0  ;;  %p74_p5 = scmp.eq.s32.totalorder %s261_s13, 1 }
   0xa   : > { %p484_p4 = por %p68_p2, %p67_p1  ;;  %s52_s17 = ssub.s32 %s425_s10, %s567_s14 }
   0xb   : > { %p262_p6 = scmp.ge.s32.totalorder %s429_s11, 1  ;;  %p55_p7 = scmp.eq.s32.totalorder %s52_s17, 0 }
   0xc   : > { %p491_p8 = por %p74_p5, %p73_p3  ;;  %p81_p9 = scmp.lt.s32.totalorder %s429_s11, 3 }
   0xd   : > { %s497_s19 = scalar_select %p55_p7, %s417_s8, %s57_s15  }
   0xe   : > { %p82_p10 = pnand %p262_p6, %p81_p9  ;;  %p285_p11 = scmp.eq.s32.totalorder %s260_s12, 0 }
   0xf   : > { %s431_s20 = smov [#allocation2]  }
  0x10   : > { %p277_p12 = pneg %p82_p10  ;;  %105 = sbr.rel (%p82_p10) target bundleno = 67 (0x43), region = 24 }
  0x12   : > { %p278_p13 = pnand %p285_p11, %p277_p12 }
  0x14   : > { %280 = dma.hbm_to_smem (!%p278_p13), %s555_s0, 16, %s431_s20, [#allocation4]  }
  0x15   : > { %400 = dma.done.wait (%p285_p11), [#allocation4], 16  }
  0x16   : > { %402 = vsyncadd (%p285_p11), [#allocation4], 4294967280 }
  0x17   : > { %111 = sfence }
  0x18   : > { %v122_v0 = vlaneseq  ;;  %s148_s23 = smul.u32 6, %s421_s9  ;;  %v432_v2 = vmov 0   ;;  %s118_s12 = sand.u32 1, %s413_s7  }
  0x19   : > { %s266_s13 = sshll.u32 %s118_s12, 2  ;;  %s268_s20 = sshll.u32 %s421_s9, 6 }
  0x1a   : > { %v123_v1 = vand.u32 127, %v122_v0  ;;  %s150_s24 = sadd.s32 1, %s148_s23  ;;  %s503_s25 = sld [smem:[#allocation2 + %s148_s23]]  ;;  %v144_v17 = vshrl.u32 %v122_v0, 7 }
  0x1b   : > { %s154_s26 = sadd.s32 3, %s148_s23  ;;  %s156_s27 = sadd.s32 4, %s148_s23 }
  0x1c   : > { %vm124_vm0 = vcmp.ge.s32.totalorder %v123_v1, 32  ;;  %vm126_vm1 = vcmp.ge.s32.totalorder %v123_v1, 64  ;;  %vm129_vm2 = vcmp.ge.s32.totalorder %v123_v1, 96  ;;  %s151_s28 = sld [smem:[#allocation2 + %s150_s24]]  ;;  %s152_s30 = sadd.s32 2, %s148_s23  ;;  %v135_v9 = vand.u32 1, %v123_v1 }
  0x1d   : > { %v125_v3 = vsel %vm124_vm0, 1, %v432_v2  ;;  %v127_v4 = vsel %vm126_vm1, 1, %v432_v2  ;;  %v130_v5 = vsel %vm129_vm2, 1, %v432_v2  ;;  %s157_s29 = sld [smem:[#allocation2 + %s156_s27]]  ;;  %s158_s3 = sadd.s32 5, %s148_s23  ;;  %v147_v24 = vcvt.s32.f32 %v144_v17 }
  0x1e   : > { %v128_v6 = vadd.s32 %v127_v4, %v125_v3  ;;  %s155_s2 = sld [smem:[#allocation2 + %s154_s26]]  ;;  %vm505_vm3 = vcmp.eq.s32.totalorder %v135_v9, 0  ;;  %s120_s15 = scalar_lea.vmem [#allocation5], %s266_s13 }
  0x1f   : > { %s153_s4 = sld [smem:[#allocation2 + %s152_s30]]  ;;  %s192_s17 = sshll.u32 %s120_s15, 4  ;;  %s193_s17 = int_to_ptr.vmem [resolvable:$true] %s192_s17 }
  0x20   : > { %v131_v7 = vadd.s32 %v130_v5, %v128_v6  ;;  %s159_s5 = sld [smem:[#allocation2 + %s158_s3]]  ;;  %v160_v20 = vstv %s503_s25  ;;  %s190_s23 = scalar_lea.hbm %s556_s1, %s268_s20 }
  0x21   : > { %s178_s24 = scalar_lea.sflag [#allocation3], %s118_s12  ;;  %s349_s25 = scalar_lea.vmem %s193_s17, 64 }
  0x22   : > { %v132_v8 = vmul.u32 32, %v131_v7  ;;  %v140_v10 = vcvt.s32.f32 %v131_v7  ;;  %v163_v15 = vstv %s151_s28  ;;  %p350_p0 = scmp.ne.s32.totalorder %s193_s17, %s349_s25  ;;  %s433_s26 = smov [#allocation5]  }
  0x23   : > { %v164_v16 = vstv %s157_s29  ;;  %s353_s27 = sshll.u32 %s433_s26, 4  ;;  %s354_s27 = int_to_ptr.vmem [resolvable:$false] %s353_s27 }
  0x24   : > { %v133_v11 = vsub.s32 %v123_v1, %v132_v8  ;;  %v141_v12 = vmul.f32 0.125, %v140_v10  ;;  %v161_v21 = vstv %s155_s2  ;;  %v165_v22 = vsel %vm505_vm3, %v163_v15, %v164_v16  ;;  %p351_p1 = pnand %p350_p0, %p484_p4  ;;  %s355_s28 = scalar_lea.vmem %s354_s27, 128 }
  0x25   : > { %v162_v25 = vsel %vm505_vm3, %v160_v20, %v161_v21  ;;  %v166_v26 = vstv %s153_s4  ;;  %v173_v30 = vmul.f32 0.5, %v165_v22  ;;  %p356_p3 = scmp.lt.s32.totalorder %s193_s17, %s354_s27  ;;  %p357_p5 = scmp.lt.s32.totalorder %s355_s28, %s349_s25 }
  0x26   : > { %v134_v13 = vshra.s32 %v133_v11, 1  ;;  %v142_v19 = vadd.f32 -0.9375, %v141_v12  ;;  %v167_v28 = vstv %s159_s5  ;;  %p352_p2 = pneg %p351_p1 }
  0x27   : > { %v168_v32 = vsel %vm505_vm3, %v166_v26, %v167_v28  ;;  %v174_v34 = vmul.f32 %v173_v30, %v147_v24  ;;  %p358_p6 = por %p357_p5, %p356_p3 }
  0x28   : > { %v137_v18 = vcvt.s32.f32 %v134_v13  ;;  %v170_v29 = vmul.f32 %v165_v22, %v142_v19 }
  0x29   : > { %p359_p7 = pnand %p358_p6, %p352_p2 }
  0x2a   : > { %v138_v23 = vmul.f32 0.125, %v137_v18 }
  0x2c   : > { %v139_v27 = vadd.f32 -0.9375, %v138_v23 }
  0x2e   : > { %v169_v31 = vmul.f32 %v162_v25, %v139_v27 }
  0x30   : > { %v171_v33 = vadd.f32 %v170_v29, %v169_v31 }
  0x32   : > { %v172_v35 = vadd.f32 %v171_v33, %v168_v32 }
  0x34   : > { %v175_v36 = vadd.f32 %v174_v34, %v172_v35 }
  0x36   : > { %176 = vst [vmem:[%s120_s15] sm:$0xf] %v175_v36 }
  0x37   : > { %362 = shalt.err (!%p359_p7)
}
  0x38   : > { %s363_s9 = scalar_lea.hbm %s190_s23, 64  ;;  %s367_s2 = scalar_lea.hbm %s556_s1, 128 }
  0x39   : > { %p364_p9 = scmp.ne.s32.totalorder %s190_s23, %s363_s9  ;;  %p368_p12 = scmp.lt.s32.totalorder %s190_s23, %s556_s1 }
  0x3a   : > { %p369_p13 = scmp.lt.s32.totalorder %s367_s2, %s363_s9 }
  0x3b   : > { %p365_p10 = pnand %p364_p9, %p484_p4 }
  0x3c   : > { %p370_p0 = por %p369_p13, %p368_p12 }
  0x3d   : > { %p366_p11 = pneg %p365_p10 }
  0x3f   : > { %p371_p1 = pnand %p370_p0, %p366_p11 }
  0x41   : > { %374 = shalt.err (!%p371_p1)
}
  0x42   : > { %275 = dma.vmem_to_hbm [thread:$0]  (%p484_p4), %s193_s17, 64, %s190_s23, %s178_s24  }
  0x43 PF: > { %p287_p2 = scmp.ge.s32.totalorder %s429_s11, 2  ;;  %s204_s5 = sand.u32 1, %s409_s6  }
  0x44   : > { %s205_s12 = scalar_lea.sflag [#allocation3], %s204_s5 }
  0x45   : > { %p282_p3 = pnand %p287_p2, %p491_p8 }
  0x47   : > { %p283_p5 = pneg %p282_p3 }
  0x49   : > { %404 = dma.done.wait (%p283_p5), %s205_s12, 64  }
  0x4a   : > { %406 = vsyncadd (%p283_p5), %s205_s12, 4294967232  ;;  %s15_s11 = sadd.s32 1, %s429_s11   ;;  %s561_s6 = smov %s413_s7 }
  0x4b   : > { %p12_p6 = scmp.ge.s32.totalorder %s15_s11, 4   ;;  %s562_s7 = smov %s417_s8 }
  0x4c   : > { %s563_s8 = smov %s497_s19  ;;  %s564_s9 = smov %s425_s10 }
  0x4d   : > { %s565_s10 = smov %s567_s14  ;;  %14 = sbr.rel (!%p12_p6) target bundleno = 5 (0x5), region = 61 }
  0x52   :  { %210 = vsyncpa [#allocation3], 1 }
  0x53   :  { %212 = vsyncpa [#allocation3 + $0x1], 1 }
  0x54   :  { %213 = vsyncpa [#allocation4], 1 }
  0x55   :  { %215 = vsyncpa [#allocation4 + $0x1], 1 }

</bundles_post_ra>
